<compile_context>
chip_gen: v5e
topology: v5e:2x2
jax: 0.10.0
libtpu: 0.0.40
codegen_flags: <defaults>
</compile_context>

<pallas_src>
import jax
import jax.numpy as jnp
from jax.experimental import pallas as pl
from jax.experimental.pallas import tpu as pltpu

_LANE = 128      # lane width of a vreg (last dim)
_SUBLANE = 8     # sublane width of a vreg (second-to-last dim)


def _round_up(n: int, m: int) -> int:
    return ((n + m - 1) // m) * m


def _cdiv(a: int, b: int) -> int:
    return -(-a // b)


def simple_nn_kernel(x_ref, w1_ref, b1_ref, w2_ref, b2_ref, o_ref):
    # fc1 + ReLU: MXU matmul with f32 accumulation, bias/ReLU on the VPU.
    h = jnp.dot(x_ref[...], w1_ref[...], preferred_element_type=jnp.float32)
    h = jnp.maximum(h + b1_ref[...], 0.0)          # b1 is [1, Hp], broadcasts
    # fc2 (everything is f32; no cast needed).
    y = jnp.dot(h, w2_ref[...], preferred_element_type=jnp.float32)
    o_ref[...] = (y + b2_ref[...]).astype(o_ref.dtype)


def _choose_batch_tiling(B: int, block_b: int):
    """Pick (tb, n_blocks, B_p): sublane-aligned batch blocks of equal size.

    Prefers >= 2 and an even number of blocks (when the batch is big enough)
    so the 'parallel' grid axis splits evenly across v7x's two TensorCores;
    this is free on single-TC chips (v5e / v6e).
    """
    B_al = _round_up(B, _SUBLANE)
    n = max(1, _cdiv(B_al, block_b))
    if B_al >= 2 * _SUBLANE:
        if n == 1:
            n = 2
        elif n % 2:
            n += 1
    tb = _round_up(_cdiv(B_al, n), _SUBLANE)
    B_p = tb * n
    return tb, n, B_p


def simple_nn_forward(x, w1, b1, w2, b2, *, block_b: int = 2048):
    """Fused MLP forward.

    x:  [B, D_in]      (unpadded; streamed through the kernel as-is)
    w1: [D_in, H_p]    b1: [1, H_p]     (hidden dim padded to 128 ONCE offline)
    w2: [H_p, D_out]   b2: [1, D_out]   (weights transposed vs. PyTorch)
    """
    B, D_in = x.shape
    H_p = w1.shape[1]
    D_out = w2.shape[1]
    f32 = x.dtype

    tb, n_blocks, B_p = _choose_batch_tiling(B, block_b)

    # Only batch-row padding (often zero rows for common batch sizes).
    xp = jnp.pad(x, ((0, B_p - B), (0, 0))) if B_p != B else x

    # Tight VMEM budget from actual usage: double-buffered x/y blocks plus
    # resident (constant index_map) params, with generous headroom.
    itemsize = jnp.dtype(f32).itemsize
    usage = (2 * (tb * D_in + tb * D_out)
             + 2 * (D_in * H_p + H_p + H_p * D_out + D_out)) * itemsize
    vmem_limit = int(min(64 * 1024 * 1024, max(4 * 1024 * 1024, 2 * usage)))

    out_p = pl.pallas_call(
        simple_nn_kernel,
        out_shape=jax.ShapeDtypeStruct((B_p, D_out), f32),
        grid_spec=pl.GridSpec(
            grid=(n_blocks,),
            in_specs=[
                # x: tiled over batch only (double-buffered by the pipeline).
                pl.BlockSpec((tb, D_in), lambda i: (i, 0)),
                # Params: constant index_map -> fetched once, VMEM-resident.
                pl.BlockSpec((D_in, H_p), lambda i: (0, 0)),
                pl.BlockSpec((1, H_p), lambda i: (0, 0)),
                pl.BlockSpec((H_p, D_out), lambda i: (0, 0)),
                pl.BlockSpec((1, D_out), lambda i: (0, 0)),
            ],
            # Narrow (D_out-wide) output block: a few masked stores per block
            # is far cheaper than 64x the HBM write traffic of lane padding.
            out_specs=pl.BlockSpec((tb, D_out), lambda i: (i, 0)),
        ),
        compiler_params=pltpu.CompilerParams(
            # Independent batch blocks -> megacore-shardable (v7x: 2 TCs).
            dimension_semantics=("parallel",),
            vmem_limit_bytes=vmem_limit,
        ),
    )(xp, w1, b1, w2, b2)

    # Strip batch-row padding only (no feature-dim slicing needed).
    return out_p[:B] if B_p != B else out_p


def init_params(key, input_size, hidden, output_size, dtype=jnp.float32):
    # Deterministic init mimicking PyTorch nn.Linear default:
    # U(-1/sqrt(fan_in), 1/sqrt(fan_in)) for both weight and bias.
    k1, k2, k3, k4 = jax.random.split(key, 4)
    bound1 = 1.0 / jnp.sqrt(input_size)
    bound2 = 1.0 / jnp.sqrt(hidden)
    w1 = jax.random.uniform(k1, (input_size, hidden), dtype, -bound1, bound1)
    b1 = jax.random.uniform(k2, (1, hidden), dtype, -bound1, bound1)
    w2 = jax.random.uniform(k3, (hidden, output_size), dtype, -bound2, bound2)
    b2 = jax.random.uniform(k4, (1, output_size), dtype, -bound2, bound2)
    return w1, b1, w2, b2


def pad_hidden_for_kernel(w1, b1, w2, b2, lane: int = _LANE):
    """One-time (offline) zero-padding of the hidden dim 64 -> 128.

    Zero columns of w1 + zero bias entries give zero activations after ReLU,
    and the matching zero rows of w2 contribute nothing — mathematically
    transparent.  Done once at parameter-setup time, NOT per forward call.
    """
    H = w1.shape[1]
    H_p = _round_up(max(H, lane), lane)
    w1p = jnp.pad(w1, ((0, 0), (0, H_p - H)))
    b1p = jnp.pad(b1, ((0, 0), (0, H_p - H)))
    w2p = jnp.pad(w2, ((0, H_p - H), (0, 0)))
    return w1p, b1p, w2p, b2


if __name__ == "__main__":
    # Shapes consistent with the module: input_size=32, hidden=64 (fixed by
    # the module), output_size=2 (the x0, x1 coordinates).
    D_IN, HIDDEN, D_OUT = 32, 64, 2

    key = jax.random.PRNGKey(0)
    kx, kp, kx2 = jax.random.split(key, 3)
    w1, b1, w2, b2 = init_params(kp, D_IN, HIDDEN, D_OUT)
    # One-time hidden-dim padding of the (tiny) weights for the kernel.
    w1p, b1p, w2p, b2p = pad_hidden_for_kernel(w1, b1, w2, b2)

    def ref_fn(x):
        return jnp.maximum(x @ w1 + b1, 0.0) @ w2 + b2

    # 1) Small batch (single grid step; narrow unpadded x/y path).
    B = 8
    x = jax.random.normal(kx, (B, D_IN), dtype=jnp.float32)
    out = jax.block_until_ready(simple_nn_forward(x, w1p, b1p, w2p, b2p))
    assert out.shape == (B, D_OUT)
    assert jnp.allclose(out, ref_fn(x), atol=1e-5, rtol=1e-5)

    # 2) Multi-block batch: 640 rows with block_b=256 -> 4 equal blocks of 160
    #    rows (even count for v7x megacore, no batch padding needed).
    B2 = 640
    x2 = jax.random.normal(kx2, (B2, D_IN), dtype=jnp.float32)
    out2 = jax.block_until_ready(
        simple_nn_forward(x2, w1p, b1p, w2p, b2p, block_b=256))
    assert out2.shape == (B2, D_OUT)
    assert jnp.allclose(out2, ref_fn(x2), atol=1e-5, rtol=1e-5)

    print("KERNEL_OK")
</pallas_src>

<mosaic_0001>
module attributes {stable_mosaic.version = 11 : i64} {
  func.func @simple_nn_kernel(%arg0: i32, %arg1: memref<8x32xf32, #tpu.memory_space<vmem>>, %arg2: memref<32x128xf32, #tpu.memory_space<vmem>>, %arg3: memref<1x128xf32, #tpu.memory_space<vmem>>, %arg4: memref<128x2xf32, #tpu.memory_space<vmem>>, %arg5: memref<1x2xf32, #tpu.memory_space<vmem>>, %arg6: memref<8x2xf32, #tpu.memory_space<vmem>>) attributes {dimension_semantics = [#tpu.dimension_semantics<parallel>], iteration_bounds = array<i64: 1>, scalar_prefetch = 0 : i64, scratch_operands = 0 : i64, tpu.core_type = #tpu.core_type<tc>, window_params = [{transform_indices = @transform_0, window_bounds = array<i64: 8, 32>}, {pipeline_mode = #tpu.pipeline_mode<synchronous>, transform_indices = @transform_1, window_bounds = array<i64: 32, 128>}, {pipeline_mode = #tpu.pipeline_mode<synchronous>, transform_indices = @transform_2, window_bounds = array<i64: 1, 128>}, {pipeline_mode = #tpu.pipeline_mode<synchronous>, transform_indices = @transform_3, window_bounds = array<i64: 128, 2>}, {pipeline_mode = #tpu.pipeline_mode<synchronous>, transform_indices = @transform_4, window_bounds = array<i64: 1, 2>}, {transform_indices = @transform_5, window_bounds = array<i64: 8, 2>}]} {
    %c0 = arith.constant 0 : index
    %c0_0 = arith.constant 0 : index
    %0 = vector.load %arg1[%c0, %c0_0] : memref<8x32xf32, #tpu.memory_space<vmem>>, vector<8x32xf32>
    %c0_1 = arith.constant 0 : index
    %c0_2 = arith.constant 0 : index
    %1 = vector.load %arg2[%c0_1, %c0_2] : memref<32x128xf32, #tpu.memory_space<vmem>>, vector<32x128xf32>
    %cst = arith.constant dense<0.000000e+00> : vector<8x128xf32>
    %2 = tpu.matmul %0, %1, %cst {dimension_numbers = #tpu.dot_dimension_numbers<[1], [0], [0], [1], [0, 0, 1, 1], [], []>} : vector<8x32xf32>, vector<32x128xf32>, vector<8x128xf32> -> vector<8x128xf32>
    %c0_3 = arith.constant 0 : index
    %c0_4 = arith.constant 0 : index
    %3 = vector.load %arg3[%c0_3, %c0_4] : memref<1x128xf32, #tpu.memory_space<vmem>>, vector<1x128xf32>
    %4 = vector.broadcast %3 : vector<1x128xf32> to vector<8x128xf32>
    %5 = arith.addf %2, %4 : vector<8x128xf32>
    %cst_5 = arith.constant 0.000000e+00 : f32
    %6 = vector.broadcast %cst_5 : f32 to vector<8x128xf32>
    %7 = arith.maximumf %5, %6 : vector<8x128xf32>
    %c0_6 = arith.constant 0 : index
    %c0_7 = arith.constant 0 : index
    %8 = vector.load %arg4[%c0_6, %c0_7] : memref<128x2xf32, #tpu.memory_space<vmem>>, vector<128x2xf32>
    %cst_8 = arith.constant dense<0.000000e+00> : vector<8x2xf32>
    %9 = tpu.matmul %7, %8, %cst_8 {dimension_numbers = #tpu.dot_dimension_numbers<[1], [0], [0], [1], [0, 0, 1, 1], [], []>} : vector<8x128xf32>, vector<128x2xf32>, vector<8x2xf32> -> vector<8x2xf32>
    %c0_9 = arith.constant 0 : index
    %c0_10 = arith.constant 0 : index
    %10 = vector.load %arg5[%c0_9, %c0_10] : memref<1x2xf32, #tpu.memory_space<vmem>>, vector<1x2xf32>
    %11 = vector.broadcast %10 : vector<1x2xf32> to vector<8x2xf32>
    %12 = arith.addf %9, %11 : vector<8x2xf32>
    %c0_11 = arith.constant 0 : index
    %c0_12 = arith.constant 0 : index
    %13 = vector.load %arg6[%c0_11, %c0_12] : memref<8x2xf32, #tpu.memory_space<vmem>>, vector<8x2xf32>
    tpu.vector_store %arg6[%c0_11, %c0_12], %12 {strides = array<i32>} : memref<8x2xf32, #tpu.memory_space<vmem>>, vector<8x2xf32>,
    return
  }
  func.func @transform_0(%arg0: i32) -> (i32, i32) {
    %c0_i32 = arith.constant 0 : i32
    %c0_i32_0 = arith.constant 0 : i32
    return %arg0, %c0_i32 : i32, i32
  }
  func.func @transform_1(%arg0: i32) -> (i32, i32) {
    %c0_i32 = arith.constant 0 : i32
    %c0_i32_0 = arith.constant 0 : i32
    %c0_i32_1 = arith.constant 0 : i32
    return %c0_i32, %c0_i32_0 : i32, i32
  }
  func.func @transform_2(%arg0: i32) -> (i32, i32) {
    %c0_i32 = arith.constant 0 : i32
    %c0_i32_0 = arith.constant 0 : i32
    %c0_i32_1 = arith.constant 0 : i32
    return %c0_i32, %c0_i32_0 : i32, i32
  }
  func.func @transform_3(%arg0: i32) -> (i32, i32) {
    %c0_i32 = arith.constant 0 : i32
    %c0_i32_0 = arith.constant 0 : i32
    %c0_i32_1 = arith.constant 0 : i32
    return %c0_i32, %c0_i32_0 : i32, i32
  }
  func.func @transform_4(%arg0: i32) -> (i32, i32) {
    %c0_i32 = arith.constant 0 : i32
    %c0_i32_0 = arith.constant 0 : i32
    %c0_i32_1 = arith.constant 0 : i32
    return %c0_i32, %c0_i32_0 : i32, i32
  }
  func.func @transform_5(%arg0: i32) -> (i32, i32) {
    %c0_i32 = arith.constant 0 : i32
    %c0_i32_0 = arith.constant 0 : i32
    return %arg0, %c0_i32 : i32, i32
  }
}

</mosaic_0001>

<bundles_post_ra>
// kernel: tpu_custom_call.1
= control target key start
LH: loop header
LB: loop body
LE: loop exit
PB: predicated region body
PF: predicated region fallthrough
CT: control target
= control target key end

     0   :  { %vm29_vm0 = vcmask 261120   ;;  %vm94_vm1 = vcmask 15360   ;;  %s205_s1 = inlined_call_operand.vmem [shape: f32[32,128], index: 1, kind: input, shape index: {}]   ;;  %s206_s3 = inlined_call_operand.vmem [shape: f32[128,2], index: 3, kind: input, shape index: {}]   ;;  %s207_s0 = inlined_call_operand.vmem [shape: f32[8,32], index: 0, kind: input, shape index: {}]   ;;  %s208_s2 = inlined_call_operand.vmem [shape: f32[1,128], index: 2, kind: input, shape index: {}]   ;;  %s209_s4 = inlined_call_operand.vmem [shape: f32[1,2], index: 4, kind: input, shape index: {}]   ;;  %s210_s5 = inlined_call_operand.vmem [shape: f32[8,2], index: 5, kind: output, shape index: {}]  }
   0x1   :  { %v24_v0 = vld [vmem:[%s205_s1 + $0x18] sm:$0xff]  ;;  %v23_v1 = vld [vmem:[%s205_s1 + $0x10] sm:$0xff]  ;;  %v22_v3 = vld [vmem:[%s205_s1 + $0x8] sm:$0xff] }
   0x2   :  { %45 = vmatpush.msra.mxu0 %v24_v0  ;;  %v69_v2 = vld [vmem:[%s206_s3 + $0x78] sm:$0xff]  ;;  %v68_v4 = vld [vmem:[%s206_s3 + $0x70] sm:$0xff]  ;;  %v67_v5 = vld [vmem:[%s206_s3 + $0x68] sm:$0xff] }
   0x3   :  { %74 = vmatpush.msra.mxu1 %v69_v2  ;;  %v21_v6 = vld [vmem:[%s205_s1] sm:$0xff]  ;;  %v65_v9 = vld [vmem:[%s206_s3 + $0x58] sm:$0xff]  ;;  %v64_v10 = vld [vmem:[%s206_s3 + $0x50] sm:$0xff] }
   0x4   :  { %46 = vmatpush.msra.mxu0 %v23_v1  ;;  %v20_v7 = vld [vmem:[%s207_s0] sm:$0xff]  ;;  %v63_v11 = vld [vmem:[%s206_s3 + $0x48] sm:$0xff]  ;;  %v61_v13 = vld [vmem:[%s206_s3 + $0x38] sm:$0xff] }
   0x5   :  { %75 = vmatpush.msra.mxu1 %v68_v4  ;;  %v66_v8 = vld [vmem:[%s206_s3 + $0x60] sm:$0xff]  ;;  %v60_v14 = vld [vmem:[%s206_s3 + $0x30] sm:$0xff]  ;;  %v59_v15 = vld [vmem:[%s206_s3 + $0x28] sm:$0xff] }
   0x6   :  { %47 = vmatpush.msra.mxu0 %v22_v3  ;;  %v62_v12 = vld [vmem:[%s206_s3 + $0x40] sm:$0xff]  ;;  %v57_v17 = vld [vmem:[%s206_s3 + $0x18] sm:$0xff]  ;;  %v56_v18 = vld [vmem:[%s206_s3 + $0x10] sm:$0xff] }
   0x7   :  { %76 = vmatpush.msra.mxu1 %v67_v5  ;;  %v58_v16 = vld [vmem:[%s206_s3 + $0x20] sm:$0xff]  ;;  %v55_v19 = vld [vmem:[%s206_s3 + $0x8] sm:$0xff] }
   0x8   :  { %48 = vmatpush.msra.mxu0 %v21_v6  ;;  %v54_v20 = vld [vmem:[%s206_s3] sm:$0xff] }
   0x9   :  { %100 = vmatmul.msk.f32.vlgmr.msra.gmra.mxu0 %vm29_vm0, %v20_v7  ;;  %77 = vmatpush.msra.mxu1 %v66_v8  ;;  %v101_v21 = vld [vmem:[%s208_s2] ss:$0 sm:$0xff] }
   0xa   :  { %v102_v25 = vld [vmem:[%s209_s4] ss:$0 sm:$0xff] }
   0xb   :  { %78 = vmatpush.msra.mxu1 %v65_v9 }
   0xd   :  { %79 = vmatpush.msra.mxu1 %v64_v10 }
   0xf   :  { %80 = vmatpush.msra.mxu1 %v63_v11 }
  0x11   :  { %81 = vmatpush.msra.mxu1 %v62_v12 }
  0x13   :  { %82 = vmatpush.msra.mxu1 %v61_v13 }
  0x15   :  { %83 = vmatpush.msra.mxu1 %v60_v14 }
  0x17   :  { %84 = vmatpush.msra.mxu1 %v59_v15 }
  0x19   :  { %85 = vmatpush.msra.mxu1 %v58_v16 }
  0x1b   :  { %86 = vmatpush.msra.mxu1 %v57_v17 }
  0x1d   :  { %87 = vmatpush.msra.mxu1 %v56_v18 }
  0x1f   :  { %88 = vmatpush.msra.mxu1 %v55_v19 }
  0x21   :  { %89 = vmatpush.msra.mxu1 %v54_v20 }
  0x86   :  { %v50_v22 = vpop.f32.mrf.mxu0 }
  0x87   :  { %v51_v23 = vadd.f32 %v101_v21, %v50_v22 }
  0x89   :  { %v53_v24 = vmax.f32 %v51_v23, 0.0 }
  0x8b   :  { %90 = vmatmul.f32.vlgmr.msra.gmra.mxu1 %v53_v24 }
 0x108   :  { %v91_v26 = vpop.f32.mrf.mxu1 }
 0x109   :  { %v92_v27 = vadd.f32 %v102_v25, %v91_v26 }
 0x10b   :  { %95 = vst.msk [vmem:[%s210_s5] sm:$0xff] %vm94_vm1, %v92_v27 }

</bundles_post_ra>
